<compile_context>
chip_gen: v5e
topology: v5e:2x2
jax: 0.10.0
libtpu: 0.0.40
codegen_flags: <defaults>
</compile_context>

<pallas_src>
import math

import jax
import jax.numpy as jnp
from jax.experimental import pallas as pl
from jax.experimental.pallas import tpu as pltpu

_LANES = 128                          # vreg lane width
_TILE_BYTES_TARGET = 4 * 1024 * 1024  # ~4 MiB per VMEM buffer
_TILE_BYTES_FLOOR = 512 * 1024        # never shrink tiles below ~512 KiB
_TARGET_GRID_STEPS = 8                # pipeline depth / v7x dual-TC sharding
_VMEM_LIMIT = 32 * 1024 * 1024        # 4 double-buffered ~4 MiB tiles + headroom


def _swish_kernel(x_ref, o_ref):
    # (tn, 128) lane-dense tile. Upcast to f32 (correct on v5e; negligible VPU
    # cost for a mem-bound op). Single EUP transcendental per element via
    #   sigmoid(x) = 0.5 * (tanh(0.5 * x) + 1)
    x = x_ref[...].astype(jnp.float32)
    sig = 0.5 * (jnp.tanh(0.5 * x) + 1.0)
    o_ref[...] = (x * sig).astype(o_ref.dtype)


def _round_up(a, b):
    return -(-a // b) * b


def _cdiv(a, b):
    return -(-a // b)


def swish(x):
    """Elementwise Swish/SiLU (x * sigmoid(x)) for any shape, float dtype."""
    orig_shape = x.shape
    dtype = x.dtype
    if not jnp.issubdtype(dtype, jnp.floating):
        raise TypeError(f"swish expects a floating dtype, got {dtype}")

    total = math.prod(orig_shape) if orig_shape else 1
    if total == 0:
        return x

    itemsize = jnp.dtype(dtype).itemsize
    packing = 32 // itemsize            # native sublane packing: f32=8, bf16=16, i8=32

    aligned = (total % _LANES == 0)
    if aligned:
        # Common case: free reshape (collapse of contiguous dims), no pad, no slice.
        rows = total // _LANES
        x2d = jnp.reshape(x, (rows, _LANES))
    else:
        # Rare lane-unaligned fallback: pad only to the next full 128-lane row.
        # TODO(synk): mask the tail store in-kernel to avoid this pad/slice copy.
        rows = _cdiv(total, _LANES)
        flat = jnp.reshape(x, (-1,))
        flat = jnp.pad(flat, (0, rows * _LANES - total))  # swish(0) == 0
        x2d = jnp.reshape(flat, (rows, _LANES))

    # Tile rows: ~4 MiB per buffer, but keep >= ~8 grid steps (pipelining depth
    # and v7x megacore sharding), never below ~512 KiB, multiple of packing.
    row_bytes = _LANES * itemsize
    tn_big = max(packing, (_TILE_BYTES_TARGET // row_bytes) // packing * packing)
    tn_floor = max(packing, (_TILE_BYTES_FLOOR // row_bytes) // packing * packing)
    tn = min(tn_big, max(tn_floor, _round_up(_cdiv(rows, _TARGET_GRID_STEPS), packing)))
    tn = min(tn, _round_up(rows, packing))

    grid = (_cdiv(rows, tn),)  # ragged last block: Pallas masks boundary stores

    out2d = pl.pallas_call(
        _swish_kernel,
        out_shape=jax.ShapeDtypeStruct((rows, _LANES), dtype),
        grid=grid,
        in_specs=[pl.BlockSpec((tn, _LANES), lambda i: (i, 0))],
        out_specs=pl.BlockSpec((tn, _LANES), lambda i: (i, 0)),
        compiler_params=pltpu.CompilerParams(
            dimension_semantics=("parallel",),
            vmem_limit_bytes=_VMEM_LIMIT,
        ),
        cost_estimate=pl.CostEstimate(
            flops=4 * total,
            transcendentals=total,
            bytes_accessed=2 * total * itemsize,
        ),
    )(x2d)

    if aligned:
        return jnp.reshape(out2d, orig_shape)
    out_flat = jnp.reshape(out2d, (-1,))[:total]
    return jnp.reshape(out_flat, orig_shape)


def swish_reference(x):
    """Pure-JAX reference mirroring the PyTorch module: x * x.sigmoid()."""
    return x * jax.nn.sigmoid(x)


if __name__ == "__main__":
    # Small deterministic activation tensor (Swish is shape-agnostic).
    batch, seq, hidden = 2, 8, 32
    key = jax.random.PRNGKey(0)
    x = jax.random.normal(key, (batch, seq, hidden), dtype=jnp.float32) * 3.0

    out = jax.block_until_ready(swish(x))
    ref = swish_reference(x)
    assert out.shape == x.shape
    assert out.dtype == x.dtype
    assert jnp.allclose(out, ref, atol=1e-5, rtol=1e-5), "f32 mismatch vs reference"

    # bf16 I/O path (halves HBM traffic); math still done in f32 in-kernel.
    x_bf16 = x.astype(jnp.bfloat16)
    out_bf16 = jax.block_until_ready(swish(x_bf16))
    ref_bf16 = swish_reference(x_bf16.astype(jnp.float32)).astype(jnp.bfloat16)
    assert out_bf16.dtype == jnp.bfloat16
    assert jnp.allclose(out_bf16.astype(jnp.float32),
                        ref_bf16.astype(jnp.float32), atol=2e-2, rtol=2e-2), \
        "bf16 mismatch vs reference"

    # Lane-unaligned fallback path (total % 128 != 0).
    x_odd = jax.random.normal(jax.random.PRNGKey(0), (3, 7, 5), dtype=jnp.float32)
    out_odd = jax.block_until_ready(swish(x_odd))
    assert out_odd.shape == x_odd.shape
    assert jnp.allclose(out_odd, swish_reference(x_odd), atol=1e-5, rtol=1e-5), \
        "unaligned-path mismatch vs reference"

    print("KERNEL_OK")
</pallas_src>

<mosaic_0001>
module attributes {stable_mosaic.version = 11 : i64} {
  func.func @_swish_kernel(%arg0: i32, %arg1: memref<8x128xf32, #tpu.memory_space<vmem>>, %arg2: memref<8x128xf32, #tpu.memory_space<vmem>>) attributes {dimension_semantics = [#tpu.dimension_semantics<parallel>], iteration_bounds = array<i64: 1>, scalar_prefetch = 0 : i64, scratch_operands = 0 : i64, tpu.core_type = #tpu.core_type<tc>, window_params = [{transform_indices = @transform_0, window_bounds = array<i64: 8, 128>}, {transform_indices = @transform_1, window_bounds = array<i64: 8, 128>}]} {
    %c0 = arith.constant 0 : index
    %c0_0 = arith.constant 0 : index
    %0 = vector.load %arg1[%c0, %c0_0] : memref<8x128xf32, #tpu.memory_space<vmem>>, vector<8x128xf32>
    %cst = arith.constant 5.000000e-01 : f32
    %1 = vector.broadcast %cst : f32 to vector<8x128xf32>
    %2 = arith.mulf %1, %0 : vector<8x128xf32>
    %3 = math.tanh %2 : vector<8x128xf32>
    %cst_1 = arith.constant 1.000000e+00 : f32
    %4 = vector.broadcast %cst_1 : f32 to vector<8x128xf32>
    %5 = arith.addf %3, %4 : vector<8x128xf32>
    %cst_2 = arith.constant 5.000000e-01 : f32
    %6 = vector.broadcast %cst_2 : f32 to vector<8x128xf32>
    %7 = arith.mulf %6, %5 : vector<8x128xf32>
    %8 = arith.mulf %0, %7 : vector<8x128xf32>
    %c0_3 = arith.constant 0 : index
    %c0_4 = arith.constant 0 : index
    %9 = vector.load %arg2[%c0_3, %c0_4] : memref<8x128xf32, #tpu.memory_space<vmem>>, vector<8x128xf32>
    tpu.vector_store %arg2[%c0_3, %c0_4], %8 {strides = array<i32>} : memref<8x128xf32, #tpu.memory_space<vmem>>, vector<8x128xf32>,
    return
  }
  func.func @transform_0(%arg0: i32) -> (i32, i32) {
    %c0_i32 = arith.constant 0 : i32
    %c0_i32_0 = arith.constant 0 : i32
    return %arg0, %c0_i32 : i32, i32
  }
  func.func @transform_1(%arg0: i32) -> (i32, i32) {
    %c0_i32 = arith.constant 0 : i32
    %c0_i32_0 = arith.constant 0 : i32
    return %arg0, %c0_i32 : i32, i32
  }
}

</mosaic_0001>

<bundles_post_ra>
// kernel: tpu_custom_call.1
= control target key start
LH: loop header
LB: loop body
LE: loop exit
PB: predicated region body
PF: predicated region fallthrough
CT: control target
= control target key end

     0   :  { %6 = vsyncpa [#allocation3], 0  ;;  %s129_s0 = inlined_call_operand.hbm [shape: f32[4,128], index: 0, kind: input, shape index: {}]   ;;  %s130_s1 = inlined_call_operand.hbm [shape: f32[4,128], index: 1, kind: output, shape index: {}]  }
   0x1   :  { %7 = vsyncpa [#allocation4], 0 }
   0x2   :  { %11 = vsyncadd [#allocation3], 64  ;;  %s12_s8 = sshll.u32 %s129_s0, 4  ;;  %s109_s9 = smov [#allocation2]   ;;  %s13_s8 = int_to_ptr.hbm [resolvable:$true] %s12_s8 }
   0x3   :  { %s14_s10 = sshll.u32 %s109_s9, 4  ;;  %s110_s11 = smov 64   ;;  %s15_s10 = int_to_ptr.vmem [resolvable:$true] %s14_s10 }
   0x4   :  { %s111_s12 = smov 4  }
   0x5   :  { %20 = dma.hbm_to_vmem [thread:$0]  %s13_s8, 64, %s15_s10, [#allocation3], %s110_s11, %s110_s11, %s111_s12  }
   0x6   :  { %105 = dma.done.wait [#allocation3], 128  }
   0x7   :  { %106 = vsyncadd [#allocation3], 4294967168  ;;  %v25_v0 = vld [vmem:[#allocation2] sm:$0xff] }
   0x8   :  { %v26_v1 = vmul.f32 0.5, %v25_v0 }
   0xa   :  { %55 = vtanh.f32 %v26_v1 }
  0x10   :  { %v56_v2 = vpop.eup %55 }
  0x11   :  { %v28_v3 = vadd.f32 1.0, %v56_v2 }
  0x13   :  { %v29_v4 = vmul.f32 0.5, %v28_v3 }
  0x15   :  { %v30_v5 = vmul.f32 %v29_v4, %v25_v0 }
  0x17   :  { %31 = vst [vmem:[#allocation5] sm:$0xff] %v30_v5 }
  0x18   :  { %35 = vsyncadd [#allocation4], 64  ;;  %s38_s14 = sshll.u32 %s130_s1, 4  ;;  %s112_s15 = smov [#allocation5]   ;;  %s39_s14 = int_to_ptr.hbm [resolvable:$true] %s38_s14 }
  0x19   :  { %s36_s16 = sshll.u32 %s112_s15, 4  ;;  %s37_s16 = int_to_ptr.vmem [resolvable:$true] %s36_s16 }
  0x1a   :  { %44 = dma.vmem_to_hbm [thread:$0]  %s37_s16, 64, %s39_s14, [#allocation4], %s110_s11, %s110_s11, %s111_s12  }
  0x1b   :  { %107 = dma.done.wait [#allocation4], 128  }
  0x1c   :  { %108 = vsyncadd [#allocation4], 4294967168 }
  0x1d   :  { %49 = vsyncpa [#allocation3], 1 }
  0x1e   :  { %50 = vsyncpa [#allocation4], 1 }

</bundles_post_ra>
